<compile_context>
chip_gen: v6e
topology: v6e:2x2x1
jax: 0.10.0
libtpu: 0.0.40
codegen_flags: <defaults>
</compile_context>

<pallas_src>
import functools

import jax
import jax.numpy as jnp
from jax.experimental import pallas as pl
from jax.experimental.pallas import tpu as pltpu

LANE = 128
SUBLANE = 8


def _round_up(n, m):
    return ((n + m - 1) // m) * m


def _pad2(a, rows, cols):
    r, c = a.shape
    return jnp.pad(a, ((0, rows - r), (0, cols - c)))


# --------------------------------------------------------------------------
# Pass 1: fused bf16 MLP (trunk + both streams) over one batch tile.
# Outputs: raw slab (adv in cols 0..O-1, val in col O, zeros beyond) and a
# per-tile partial adv-sum (masked to real rows / real adv columns),
# broadcast over an (8, 128) block so the store is fully dense.
# --------------------------------------------------------------------------
def _mlp_kernel(x_ref, w1_ref, b1_ref, ws1_ref, bs1_ref, ws2_ref, bs2_ref,
                raw_ref, psum_ref, *, output_size, batch, tile_b):
    x = x_ref[...]                                              # (TB, in) bf16

    # shared trunk: relu(x @ W1 + b1), bf16 MXU, f32 accumulate
    h = jnp.dot(x, w1_ref[...], preferred_element_type=jnp.float32) + b1_ref[...]
    h = jnp.maximum(h, 0.0).astype(jnp.bfloat16)

    # fused stream layer 1: [adv_hidden | val_hidden] in ONE matmul
    s1 = jnp.dot(h, ws1_ref[...], preferred_element_type=jnp.float32) + bs1_ref[...]
    s1 = jnp.maximum(s1, 0.0).astype(jnp.bfloat16)

    # fused stream layer 2 (block-diagonal): cols 0..O-1 = adv, col O = val,
    # cols > O are exactly zero (zero weight/bias padding).
    s2 = jnp.dot(s1, ws2_ref[...], preferred_element_type=jnp.float32) + bs2_ref[...]
    raw_ref[...] = s2                                           # lane-dense write

    # partial adv sum over real rows and real adv columns of this tile
    col = jax.lax.broadcasted_iota(jnp.int32, s2.shape, 1)
    row = jax.lax.broadcasted_iota(jnp.int32, s2.shape, 0) + pl.program_id(0) * tile_b
    adv_sum = jnp.sum(jnp.where((col < output_size) & (row < batch), s2, 0.0))
    psum_ref[...] = jnp.full(psum_ref.shape, adv_sum, jnp.float32)


# --------------------------------------------------------------------------
# Pass 2: combine.  mean = sum(psum) / (8*128*B*O)  (each tile's partial sum
# is replicated over an (8,128) block, hence the 8*128 factor).  Then
# out = adv + (val - mean), written lane-dense; wrapper slices real columns.
# --------------------------------------------------------------------------
def _combine_kernel(psum_ref, raw_ref, out_ref, *, output_size, inv_denom):
    s2 = raw_ref[...]
    mean = jnp.sum(psum_ref[...]) * inv_denom
    col = jax.lax.broadcasted_iota(jnp.int32, s2.shape, 1)
    val = jnp.sum(jnp.where(col == output_size, s2, 0.0), axis=-1, keepdims=True)
    out_ref[...] = s2 + (val - mean)


def fuse_and_pad_params(params):
    """Fuse adv/val streams, zero-pad weight lane dims to 128, cast to bf16."""
    (w1, b1, wa1, ba1, wa2, ba2, wv1, bv1, wv2, bv2) = params
    input_size, linear_hid = w1.shape
    adv_hid, output_size = wa2.shape
    val_hid = wv1.shape[1]

    hid_p = _round_up(linear_hid, LANE)
    stream = adv_hid + val_hid
    stream_p = _round_up(stream, LANE)
    out_p = _round_up(output_size + 1, LANE)

    # trunk (K/row dim of w1 stays = input_size so the raw, un-padded input
    # can be fed straight into the kernel)
    w1p = _pad2(w1, input_size, hid_p).astype(jnp.bfloat16)
    b1p = _pad2(b1, 1, hid_p)                                     # f32

    # fused stream layer 1: concat [wa1 | wv1]
    ws1 = jnp.concatenate([wa1, wv1], axis=1)
    bs1 = jnp.concatenate([ba1, bv1], axis=1)
    ws1p = _pad2(ws1, hid_p, stream_p).astype(jnp.bfloat16)
    bs1p = _pad2(bs1, 1, stream_p)

    # fused stream layer 2: block-diagonal [[wa2, 0], [0, wv2]]
    ws2 = jnp.zeros((stream, output_size + 1), jnp.float32)
    ws2 = ws2.at[:adv_hid, :output_size].set(wa2)
    ws2 = ws2.at[adv_hid:, output_size:].set(wv2)
    bs2 = jnp.concatenate([ba2, bv2], axis=1)
    ws2p = _pad2(ws2, stream_p, out_p).astype(jnp.bfloat16)
    bs2p = _pad2(bs2, 1, out_p)

    fused = (w1p, b1p, ws1p, bs1p, ws2p, bs2p)
    meta = dict(input_size=input_size, output_size=output_size, out_p=out_p)
    return fused, meta


def dueling_dqn_forward(state, fused_params, meta, *, tile_b=512):
    w1p, b1p, ws1p, bs1p, ws2p, bs2p = fused_params
    B = state.shape[0]
    output_size = meta["output_size"]
    out_p = meta["out_p"]

    # batch tiling: TB is a multiple of 8, B padded up to a whole number of tiles
    TB = _round_up(min(tile_b, _round_up(B, SUBLANE)), SUBLANE)
    B_pad = _round_up(B, TB)
    n_tiles = B_pad // TB

    # bf16 activations; only the batch (sublane) axis is padded — the lane
    # (feature) axis is passed raw, so no 8x input-DMA inflation.
    x = state.astype(jnp.bfloat16)
    if B_pad != B:
        x = jnp.pad(x, ((0, B_pad - B), (0, 0)))

    # ---------------- pass 1: fused MLP, batch-tiled, parallel ----------------
    mlp = functools.partial(_mlp_kernel, output_size=output_size,
                            batch=B, tile_b=TB)
    in_specs = [
        pl.BlockSpec((TB, x.shape[1]), lambda i: (i, 0)),
        pl.BlockSpec(w1p.shape, lambda i: (0, 0)),     # weights stay VMEM-resident
        pl.BlockSpec(b1p.shape, lambda i: (0, 0)),
        pl.BlockSpec(ws1p.shape, lambda i: (0, 0)),
        pl.BlockSpec(bs1p.shape, lambda i: (0, 0)),
        pl.BlockSpec(ws2p.shape, lambda i: (0, 0)),
        pl.BlockSpec(bs2p.shape, lambda i: (0, 0)),
    ]
    out_shapes = (
        jax.ShapeDtypeStruct((B_pad, out_p), jnp.float32),            # raw slab
        jax.ShapeDtypeStruct((n_tiles * SUBLANE, LANE), jnp.float32),  # partial sums
    )
    out_specs = (
        pl.BlockSpec((TB, out_p), lambda i: (i, 0)),
        pl.BlockSpec((SUBLANE, LANE), lambda i: (i, 0)),
    )
    flops = 2 * B_pad * (w1p.shape[0] * w1p.shape[1]
                         + ws1p.shape[0] * ws1p.shape[1]
                         + ws2p.shape[0] * ws2p.shape[1])
    bytes_accessed = (x.size * x.dtype.itemsize
                      + sum(int(p.size) * p.dtype.itemsize for p in fused_params)
                      + B_pad * out_p * 4 + n_tiles * SUBLANE * LANE * 4)

    raw, psum = pl.pallas_call(
        mlp,
        grid=(n_tiles,),
        in_specs=in_specs,
        out_specs=out_specs,
        out_shape=out_shapes,
        compiler_params=pltpu.CompilerParams(dimension_semantics=("parallel",)),
        cost_estimate=pl.CostEstimate(flops=flops, transcendentals=0,
                                      bytes_accessed=bytes_accessed),
    )(x, w1p, b1p, ws1p, bs1p, ws2p, bs2p)

    # ---------------- pass 2: apply val + (adv - mean), batch-tiled -----------
    combine = functools.partial(
        _combine_kernel, output_size=output_size,
        inv_denom=1.0 / (SUBLANE * LANE * B * output_size))

    out = pl.pallas_call(
        combine,
        grid=(n_tiles,),
        in_specs=[
            pl.BlockSpec(psum.shape, lambda i: (0, 0)),   # tiny, VMEM-resident
            pl.BlockSpec((TB, out_p), lambda i: (i, 0)),
        ],
        out_specs=pl.BlockSpec((TB, out_p), lambda i: (i, 0)),
        out_shape=jax.ShapeDtypeStruct((B_pad, out_p), jnp.float32),
        compiler_params=pltpu.CompilerParams(dimension_semantics=("parallel",)),
    )(psum, raw)

    # slice the real Q-values back out of the lane-dense slab
    return out[:B, :output_size]


def init_params(key, input_size, output_size, linear_hid_size, adv_hid_size,
                val_hid_size):
    """PyTorch-like init: U(-1/sqrt(fan_in), 1/sqrt(fan_in)); W as (in, out)."""
    def linear(key, fan_in, fan_out):
        kw, kb = jax.random.split(key)
        bound = 1.0 / jnp.sqrt(jnp.float32(fan_in))
        w = jax.random.uniform(kw, (fan_in, fan_out), jnp.float32, -bound, bound)
        b = jax.random.uniform(kb, (1, fan_out), jnp.float32, -bound, bound)
        return w, b

    keys = jax.random.split(key, 5)
    w1, b1 = linear(keys[0], input_size, linear_hid_size)
    wa1, ba1 = linear(keys[1], linear_hid_size, adv_hid_size)
    wa2, ba2 = linear(keys[2], adv_hid_size, output_size)
    wv1, bv1 = linear(keys[3], linear_hid_size, val_hid_size)
    wv2, bv2 = linear(keys[4], val_hid_size, 1)
    return (w1, b1, wa1, ba1, wa2, ba2, wv1, bv1, wv2, bv2)


def reference_forward(state, params):
    (w1, b1, wa1, ba1, wa2, ba2, wv1, bv1, wv2, bv2) = params
    h = jnp.maximum(state @ w1 + b1, 0.0)
    adv = jnp.maximum(h @ wa1 + ba1, 0.0) @ wa2 + ba2
    val = jnp.maximum(h @ wv1 + bv1, 0.0) @ wv2 + bv2
    return val + (adv - adv.mean())


if __name__ == "__main__":
    batch = 4
    input_size = 16
    output_size = 8
    linear_hid_size = 32
    adv_hid_size = 32
    val_hid_size = 32

    key = jax.random.PRNGKey(0)
    k_state, k_params = jax.random.split(key)
    state = jax.random.normal(k_state, (batch, input_size), dtype=jnp.float32)
    params = init_params(k_params, input_size, output_size,
                         linear_hid_size, adv_hid_size, val_hid_size)

    fused_params, meta = fuse_and_pad_params(params)

    out = dueling_dqn_forward(state, fused_params, meta)
    out = jax.block_until_ready(out)

    ref = reference_forward(state, params)
    assert out.shape == (batch, output_size)
    err = float(jnp.max(jnp.abs(out - ref)))
    # matmuls run in bf16 (per perf review) -> loose tolerance vs f32 reference
    assert err < 5e-2, f"max abs err {err}"

    print("KERNEL_OK")
</pallas_src>

<mosaic_0001>
module attributes {stable_mosaic.version = 11 : i64} {
  func.func @_mlp_kernel(%arg0: i32, %arg1: memref<8x16xbf16, #tpu.memory_space<vmem>>, %arg2: memref<16x128xbf16, #tpu.memory_space<vmem>>, %arg3: memref<1x128xf32, #tpu.memory_space<vmem>>, %arg4: memref<128x128xbf16, #tpu.memory_space<vmem>>, %arg5: memref<1x128xf32, #tpu.memory_space<vmem>>, %arg6: memref<128x128xbf16, #tpu.memory_space<vmem>>, %arg7: memref<1x128xf32, #tpu.memory_space<vmem>>, %arg8: memref<8x128xf32, #tpu.memory_space<vmem>>, %arg9: memref<8x128xf32, #tpu.memory_space<vmem>>) attributes {dimension_semantics = [#tpu.dimension_semantics<parallel>], iteration_bounds = array<i64: 1>, scalar_prefetch = 0 : i64, scratch_operands = 0 : i64, tpu.core_type = #tpu.core_type<tc>, window_params = [{transform_indices = @transform_0, window_bounds = array<i64: 8, 16>}, {pipeline_mode = #tpu.pipeline_mode<synchronous>, transform_indices = @transform_1, window_bounds = array<i64: 16, 128>}, {pipeline_mode = #tpu.pipeline_mode<synchronous>, transform_indices = @transform_2, window_bounds = array<i64: 1, 128>}, {pipeline_mode = #tpu.pipeline_mode<synchronous>, transform_indices = @transform_3, window_bounds = array<i64: 128, 128>}, {pipeline_mode = #tpu.pipeline_mode<synchronous>, transform_indices = @transform_4, window_bounds = array<i64: 1, 128>}, {pipeline_mode = #tpu.pipeline_mode<synchronous>, transform_indices = @transform_5, window_bounds = array<i64: 128, 128>}, {pipeline_mode = #tpu.pipeline_mode<synchronous>, transform_indices = @transform_6, window_bounds = array<i64: 1, 128>}, {transform_indices = @transform_7, window_bounds = array<i64: 8, 128>}, {transform_indices = @transform_8, window_bounds = array<i64: 8, 128>}]} {
    %c0 = arith.constant 0 : index
    %c0_0 = arith.constant 0 : index
    %0 = vector.load %arg1[%c0, %c0_0] : memref<8x16xbf16, #tpu.memory_space<vmem>>, vector<8x16xbf16>
    %c0_1 = arith.constant 0 : index
    %c0_2 = arith.constant 0 : index
    %1 = vector.load %arg2[%c0_1, %c0_2] : memref<16x128xbf16, #tpu.memory_space<vmem>>, vector<16x128xbf16>
    %cst = arith.constant dense<0.000000e+00> : vector<8x128xf32>
    %2 = tpu.matmul %0, %1, %cst {dimension_numbers = #tpu.dot_dimension_numbers<[1], [0], [0], [1], [0, 0, 1, 1], [], []>} : vector<8x16xbf16>, vector<16x128xbf16>, vector<8x128xf32> -> vector<8x128xf32>
    %c0_3 = arith.constant 0 : index
    %c0_4 = arith.constant 0 : index
    %3 = vector.load %arg3[%c0_3, %c0_4] : memref<1x128xf32, #tpu.memory_space<vmem>>, vector<1x128xf32>
    %4 = vector.broadcast %3 : vector<1x128xf32> to vector<8x128xf32>
    %5 = arith.addf %2, %4 : vector<8x128xf32>
    %cst_5 = arith.constant 0.000000e+00 : f32
    %6 = vector.broadcast %cst_5 : f32 to vector<8x128xf32>
    %7 = arith.maximumf %5, %6 : vector<8x128xf32>
    %8 = arith.truncf %7 : vector<8x128xf32> to vector<8x128xbf16>
    %c0_6 = arith.constant 0 : index
    %c0_7 = arith.constant 0 : index
    %9 = vector.load %arg4[%c0_6, %c0_7] : memref<128x128xbf16, #tpu.memory_space<vmem>>, vector<128x128xbf16>
    %cst_8 = arith.constant dense<0.000000e+00> : vector<8x128xf32>
    %10 = tpu.matmul %8, %9, %cst_8 {dimension_numbers = #tpu.dot_dimension_numbers<[1], [0], [0], [1], [0, 0, 1, 1], [], []>} : vector<8x128xbf16>, vector<128x128xbf16>, vector<8x128xf32> -> vector<8x128xf32>
    %c0_9 = arith.constant 0 : index
    %c0_10 = arith.constant 0 : index
    %11 = vector.load %arg5[%c0_9, %c0_10] : memref<1x128xf32, #tpu.memory_space<vmem>>, vector<1x128xf32>
    %12 = vector.broadcast %11 : vector<1x128xf32> to vector<8x128xf32>
    %13 = arith.addf %10, %12 : vector<8x128xf32>
    %cst_11 = arith.constant 0.000000e+00 : f32
    %14 = vector.broadcast %cst_11 : f32 to vector<8x128xf32>
    %15 = arith.maximumf %13, %14 : vector<8x128xf32>
    %16 = arith.truncf %15 : vector<8x128xf32> to vector<8x128xbf16>
    %c0_12 = arith.constant 0 : index
    %c0_13 = arith.constant 0 : index
    %17 = vector.load %arg6[%c0_12, %c0_13] : memref<128x128xbf16, #tpu.memory_space<vmem>>, vector<128x128xbf16>
    %cst_14 = arith.constant dense<0.000000e+00> : vector<8x128xf32>
    %18 = tpu.matmul %16, %17, %cst_14 {dimension_numbers = #tpu.dot_dimension_numbers<[1], [0], [0], [1], [0, 0, 1, 1], [], []>} : vector<8x128xbf16>, vector<128x128xbf16>, vector<8x128xf32> -> vector<8x128xf32>
    %c0_15 = arith.constant 0 : index
    %c0_16 = arith.constant 0 : index
    %19 = vector.load %arg7[%c0_15, %c0_16] : memref<1x128xf32, #tpu.memory_space<vmem>>, vector<1x128xf32>
    %20 = vector.broadcast %19 : vector<1x128xf32> to vector<8x128xf32>
    %21 = arith.addf %18, %20 : vector<8x128xf32>
    %c0_17 = arith.constant 0 : index
    %c0_18 = arith.constant 0 : index
    %22 = vector.load %arg8[%c0_17, %c0_18] : memref<8x128xf32, #tpu.memory_space<vmem>>, vector<8x128xf32>
    tpu.vector_store %arg8[%c0_17, %c0_18], %21 {strides = array<i32>} : memref<8x128xf32, #tpu.memory_space<vmem>>, vector<8x128xf32>,
    %23 = tpu.iota {dimensions = array<i32: 1>} : vector<8x128xi32>
    %24 = tpu.iota {dimensions = array<i32: 0>} : vector<8x128xi32>
    %c8_i32 = arith.constant 8 : i32
    %25 = arith.muli %arg0, %c8_i32 : i32
    %26 = vector.broadcast %25 : i32 to vector<8x128xi32>
    %27 = arith.addi %24, %26 : vector<8x128xi32>
    %c8_i32_19 = arith.constant 8 : i32
    %28 = vector.broadcast %c8_i32_19 : i32 to vector<8x128xi32>
    %29 = arith.cmpi slt, %23, %28 : vector<8x128xi32>
    %c4_i32 = arith.constant 4 : i32
    %30 = vector.broadcast %c4_i32 : i32 to vector<8x128xi32>
    %31 = arith.cmpi slt, %27, %30 : vector<8x128xi32>
    %32 = arith.andi %29, %31 : vector<8x128xi1>
    %cst_20 = arith.constant 0.000000e+00 : f32
    %33 = vector.broadcast %cst_20 : f32 to vector<8x128xf32>
    %34 = arith.select %32, %21, %33 : vector<8x128xi1>, vector<8x128xf32>
    %35 = vector.shape_cast %34 : vector<8x128xf32> to vector<1x8x128xf32>
    %cst_21 = arith.constant dense<0.000000e+00> : vector<1xf32>
    %36 = vector.multi_reduction <add>, %35, %cst_21 [1, 2] : vector<1x8x128xf32> to vector<1xf32>
    %37 = vector.shape_cast %36 : vector<1xf32> to vector<1x1x1xf32>
    %38 = vector.extract %37[0, 0, 0] : f32 from vector<1x1x1xf32>
    %39 = vector.broadcast %38 : f32 to vector<8x128xf32>
    %c0_22 = arith.constant 0 : index
    %c0_23 = arith.constant 0 : index
    %40 = vector.load %arg9[%c0_22, %c0_23] : memref<8x128xf32, #tpu.memory_space<vmem>>, vector<8x128xf32>
    tpu.vector_store %arg9[%c0_22, %c0_23], %39 {strides = array<i32>} : memref<8x128xf32, #tpu.memory_space<vmem>>, vector<8x128xf32>,
    return
  }
  func.func @transform_0(%arg0: i32) -> (i32, i32) {
    %c0_i32 = arith.constant 0 : i32
    %c0_i32_0 = arith.constant 0 : i32
    return %arg0, %c0_i32 : i32, i32
  }
  func.func @transform_1(%arg0: i32) -> (i32, i32) {
    %c0_i32 = arith.constant 0 : i32
    %c0_i32_0 = arith.constant 0 : i32
    %c0_i32_1 = arith.constant 0 : i32
    return %c0_i32, %c0_i32_0 : i32, i32
  }
  func.func @transform_2(%arg0: i32) -> (i32, i32) {
    %c0_i32 = arith.constant 0 : i32
    %c0_i32_0 = arith.constant 0 : i32
    %c0_i32_1 = arith.constant 0 : i32
    return %c0_i32, %c0_i32_0 : i32, i32
  }
  func.func @transform_3(%arg0: i32) -> (i32, i32) {
    %c0_i32 = arith.constant 0 : i32
    %c0_i32_0 = arith.constant 0 : i32
    %c0_i32_1 = arith.constant 0 : i32
    return %c0_i32, %c0_i32_0 : i32, i32
  }
  func.func @transform_4(%arg0: i32) -> (i32, i32) {
    %c0_i32 = arith.constant 0 : i32
    %c0_i32_0 = arith.constant 0 : i32
    %c0_i32_1 = arith.constant 0 : i32
    return %c0_i32, %c0_i32_0 : i32, i32
  }
  func.func @transform_5(%arg0: i32) -> (i32, i32) {
    %c0_i32 = arith.constant 0 : i32
    %c0_i32_0 = arith.constant 0 : i32
    %c0_i32_1 = arith.constant 0 : i32
    return %c0_i32, %c0_i32_0 : i32, i32
  }
  func.func @transform_6(%arg0: i32) -> (i32, i32) {
    %c0_i32 = arith.constant 0 : i32
    %c0_i32_0 = arith.constant 0 : i32
    %c0_i32_1 = arith.constant 0 : i32
    return %c0_i32, %c0_i32_0 : i32, i32
  }
  func.func @transform_7(%arg0: i32) -> (i32, i32) {
    %c0_i32 = arith.constant 0 : i32
    %c0_i32_0 = arith.constant 0 : i32
    return %arg0, %c0_i32 : i32, i32
  }
  func.func @transform_8(%arg0: i32) -> (i32, i32) {
    %c0_i32 = arith.constant 0 : i32
    %c0_i32_0 = arith.constant 0 : i32
    return %arg0, %c0_i32 : i32, i32
  }
}

</mosaic_0001>

<bundles_post_ra>
// kernel: tpu_custom_call.1
= control target key start
LH: loop header
LB: loop body
LE: loop exit
PB: predicated region body
PF: predicated region fallthrough
CT: control target
= control target key end

     0   :  { %14 = vsyncpa [#allocation3], 0  ;;  %s781_s0 = inlined_call_operand.hbm [shape: bf16[8,16], index: 0, kind: input, shape index: {}]   ;;  %s782_s1 = inlined_call_operand.hbm [shape: bf16[16,128], index: 1, kind: input, shape index: {}]   ;;  %s783_s2 = inlined_call_operand.vmem [shape: f32[1,128], index: 2, kind: input, shape index: {}]   ;;  %s784_s3 = inlined_call_operand.hbm [shape: bf16[128,128], index: 3, kind: input, shape index: {}]   ;;  %s785_s4 = inlined_call_operand.vmem [shape: f32[1,128], index: 4, kind: input, shape index: {}]   ;;  %s786_s5 = inlined_call_operand.hbm [shape: bf16[128,128], index: 5, kind: input, shape index: {}]   ;;  %s787_s6 = inlined_call_operand.vmem [shape: f32[1,128], index: 6, kind: input, shape index: {}]   ;;  %s788_s7 = inlined_call_operand.hbm [shape: f32[8,128], index: 7, kind: output, shape index: {0}]   ;;  %s789_s8 = inlined_call_operand.hbm [shape: f32[8,128], index: 8, kind: output, shape index: {1}]  }
   0x1   :  { %15 = vsyncpa [#allocation6], 0 }
   0x2   :  { %16 = vsyncpa [#allocation9], 0 }
   0x3   :  { %17 = vsyncpa [#allocation4], 0 }
   0x4   :  { %18 = vsyncpa [#allocation12], 0  ;;  %s670_s27 = smov [#allocation5]  }
   0x5   :  { %s34_s28 = sshll.u32 %s670_s27, 4  ;;  %s35_s28 = int_to_ptr.vmem [resolvable:$true] %s34_s28 }
   0x6   :  { %s548_s29 = scalar_lea.vmem %s35_s28, 128  ;;  %p553_p1 = scmp.lt.s32.totalorder %s35_s28, %s35_s28 }
   0x7   :  { %p549_p0 = scmp.ne.s32.totalorder %s35_s28, %s548_s29  ;;  %p554_p2 = scmp.lt.s32.totalorder %s548_s29, %s548_s29 }
   0x9   :  { %p555_p3 = por %p554_p2, %p553_p1 }
   0xb   :  { %p556_p4 = pnand %p555_p3, %p549_p0 }
   0xd   :  { %559 = shalt.err (!%p556_p4)
}
   0xe   :  { %s671_s30 = smov 64   ;;  %s672_s9 = smov 4  }
   0xf   :  { %40 = dma.hbm_to_vmem [thread:$0]  %s782_s1, 128, %s35_s28, [#allocation6], %s671_s30, %s671_s30, %s672_s9  }
  0x10   :  { %s673_s12 = smov [#allocation2]   ;;  %s674_s14 = smov [#allocation7]  }
  0x11   :  { %s25_s13 = sshll.u32 %s673_s12, 4  ;;  %s48_s15 = sshll.u32 %s674_s14, 4  ;;  %s26_s13 = int_to_ptr.vmem [resolvable:$true] %s25_s13  ;;  %s49_s15 = int_to_ptr.vmem [resolvable:$true] %s48_s15 }
  0x12   :  { %s568_s16 = scalar_lea.vmem %s26_s13, 64  ;;  %p573_p6 = scmp.lt.s32.totalorder %s26_s13, %s26_s13 }
  0x13   :  { %p569_p5 = scmp.ne.s32.totalorder %s26_s13, %s568_s16  ;;  %p574_p7 = scmp.lt.s32.totalorder %s568_s16, %s568_s16 }
  0x15   :  { %p575_p8 = por %p574_p7, %p573_p6 }
  0x17   :  { %p576_p9 = pnand %p575_p8, %p569_p5 }
  0x19   :  { %579 = shalt.err (!%p576_p9)
}
  0x1a   :  { %28 = dma.hbm_to_vmem [thread:$0]  %s781_s0, 64, %s26_s13, [#allocation3]  }
  0x1b   :  { %s588_s19 = scalar_lea.vmem %s49_s15, 1024  ;;  %p593_p11 = scmp.lt.s32.totalorder %s49_s15, %s49_s15 }
  0x1c   :  { %p589_p10 = scmp.ne.s32.totalorder %s49_s15, %s588_s19  ;;  %p594_p12 = scmp.lt.s32.totalorder %s588_s19, %s588_s19 }
  0x1e   :  { %p595_p13 = por %p594_p12, %p593_p11 }
  0x20   :  { %p596_p0 = pnand %p595_p13, %p589_p10 }
  0x22   :  { %599 = shalt.err (!%p596_p0)
}
  0x23   :  { %54 = dma.hbm_to_vmem [thread:$0]  %s784_s3, 1024, %s49_s15, [#allocation6], %s671_s30, %s671_s30, %s672_s9  }
  0x24   :  { %s675_s21 = smov [#allocation8]  }
  0x25   :  { %s62_s22 = sshll.u32 %s675_s21, 4  ;;  %s63_s22 = int_to_ptr.vmem [resolvable:$true] %s62_s22 }
  0x26   :  { %s608_s23 = scalar_lea.vmem %s63_s22, 1024  ;;  %p613_p2 = scmp.lt.s32.totalorder %s63_s22, %s63_s22 }
  0x27   :  { %p609_p1 = scmp.ne.s32.totalorder %s63_s22, %s608_s23  ;;  %p614_p3 = scmp.lt.s32.totalorder %s608_s23, %s608_s23 }
  0x29   :  { %p615_p4 = por %p614_p3, %p613_p2 }
  0x2b   :  { %p616_p5 = pnand %p615_p4, %p609_p1 }
  0x2d   :  { %619 = shalt.err (!%p616_p5)
}
  0x2e   :  { %68 = dma.hbm_to_vmem [thread:$0]  %s786_s5, 1024, %s63_s22, [#allocation9], %s671_s30, %s671_s30, %s672_s9  }
  0x2f   :  { %660 = dma.done.wait [#allocation3], 64  }
  0x30   :  { %661 = vsyncadd [#allocation3], 4294967232 }
  0x31   :  { %662 = dma.done.wait [#allocation6], 1152  }
  0x32   :  { %663 = vsyncadd [#allocation6], 4294966144 }
  0x33   :  { %664 = dma.done.wait [#allocation9], 1024  }
  0x34   :  { %665 = vsyncadd [#allocation9], 4294966272  ;;  %v676_v0 = vmov 0.0   ;;  %vm677_vm0 = vmmov 0   ;;  %v523_v1 = vld [vmem:[#allocation5] sm:$0xff]   ;;  %vm100_vm1 = vcmask 130048   ;;  %v371_v35 = vlaneseq }
  0x35   :  { %465 = vmatprep.subr.bf16.mxu0 %v676_v0  ;;  %467 = vmatprep.mubr.msk.bf16.mxu0 %vm677_vm0, %v676_v0  ;;  %v84_v2 = vld [vmem:[#allocation2] sm:$0xf]  ;;  %v524_v3 = vld [vmem:[#allocation7 + $0x38] sm:$0xff]   ;;  %v526_v5 = vld [vmem:[#allocation7 + $0x28] sm:$0xff]  }
  0x36   :  { %471 = vmatprep.subr.bf16.mxu1 %v676_v0  ;;  %487 = vmatprep.mubr.msk.bf16.mxu1 %vm677_vm0, %v676_v0  ;;  %v525_v4 = vld [vmem:[#allocation7 + $0x30] sm:$0xff]   ;;  %v527_v6 = vld [vmem:[#allocation7 + $0x20] sm:$0xff]   ;;  %v528_v7 = vld [vmem:[#allocation7 + $0x18] sm:$0xff]   ;;  %v372_v36 = vand.u32 127, %v371_v35  ;;  %v374_v37 = vshrl.u32 %v371_v35, 7 }
  0x37   :  { %466 = vmatpush3.bf16.msra.mxu0 %v523_v1  ;;  %472 = vmatpush3.bf16.msra.mxu1 %v524_v3  ;;  %v529_v8 = vld [vmem:[#allocation7 + $0x10] sm:$0xff]   ;;  %v530_v9 = vld [vmem:[#allocation7 + $0x8] sm:$0xff]   ;;  %v531_v10 = vld [vmem:[#allocation7] sm:$0xff]  }
  0x38   :  { %491 = vmatprep.subr.bf16.mxu0 %v676_v0  ;;  %473 = vmatprep.subr.bf16.mxu1 %v676_v0  ;;  %v532_v11 = vld [vmem:[#allocation8 + $0x38] sm:$0xff]   ;;  %v533_v12 = vld [vmem:[#allocation8 + $0x30] sm:$0xff]   ;;  %v534_v13 = vld [vmem:[#allocation8 + $0x28] sm:$0xff]   ;;  %vm378_vm2 = vcmp.lt.s32.totalorder %v372_v36, 8  ;;  %vm379_vm3 = vcmp.lt.s32.totalorder %v374_v37, 4 }
  0x39   :  { %v535_v14 = vld [vmem:[#allocation8 + $0x20] sm:$0xff]   ;;  %v536_v15 = vld [vmem:[#allocation8 + $0x18] sm:$0xff]   ;;  %v537_v16 = vld [vmem:[#allocation8 + $0x10] sm:$0xff]  }
  0x3a   :  { %468 = vmatmul.mubr.msk.bf16.vlgmr.msra.gmra.mxu0 %vm100_vm1, %v84_v2  ;;  %v424_v17 = vld [vmem:[%s783_s2] ss:$0 sm:$0xff]  ;;  %v538_v25 = vld [vmem:[#allocation8 + $0x8] sm:$0xff]   ;;  %v539_v26 = vld [vmem:[#allocation8] sm:$0xff]  }
  0x3b   :  { %507 = vmatprep.mubr.msk.bf16.mxu0 %vm677_vm0, %v676_v0  ;;  %474 = vmatpush3.bf16.msra.mxu1 %v525_v4  ;;  %v427_v27 = vld [vmem:[%s785_s4] ss:$0 sm:$0xff]  ;;  %vm380_vm4 = vmand %vm378_vm2, %vm379_vm3  ;;  %s678_s4 = smov [#allocation10]  }
  0x3c   :  { %475 = vmatprep.subr.bf16.mxu1 %v676_v0  ;;  %492 = vmatpush3.bf16.msra.mxu0 %v532_v11  ;;  %v436_v38 = vld [vmem:[%s787_s6] ss:$0 sm:$0xff]  ;;  %s399_s28 = sshll.u32 %s678_s4, 4  ;;  %s400_s28 = int_to_ptr.vmem [resolvable:$true] %s399_s28 }
  0x3d   :  { %493 = vmatprep.subr.bf16.mxu0 %v676_v0  ;;  %s620_s29 = scalar_lea.vmem %s400_s28, 128  ;;  %p625_p7 = scmp.lt.s32.totalorder %s400_s28, %s400_s28 }
  0x3e   :  { %p621_p6 = scmp.ne.s32.totalorder %s400_s28, %s620_s29  ;;  %p626_p8 = scmp.lt.s32.totalorder %s620_s29, %s620_s29 }
  0x3f   :  { %476 = vmatpush3.bf16.msra.mxu1 %v526_v5 }
  0x40   :  { %477 = vmatprep.subr.bf16.mxu1 %v676_v0  ;;  %494 = vmatpush3.bf16.msra.mxu0 %v533_v12  ;;  %p627_p9 = por %p626_p8, %p625_p7 }
  0x41   :  { %495 = vmatprep.subr.bf16.mxu0 %v676_v0 }
  0x42   :  { %p628_p10 = pnand %p627_p9, %p621_p6 }
  0x43   :  { %478 = vmatpush3.bf16.msra.mxu1 %v527_v6 }
  0x44   :  { %479 = vmatprep.subr.bf16.mxu1 %v676_v0  ;;  %496 = vmatpush3.bf16.msra.mxu0 %v534_v13 }
  0x45   :  { %497 = vmatprep.subr.bf16.mxu0 %v676_v0 }
  0x47   :  { %480 = vmatpush3.bf16.msra.mxu1 %v528_v7 }
  0x48   :  { %481 = vmatprep.subr.bf16.mxu1 %v676_v0  ;;  %498 = vmatpush3.bf16.msra.mxu0 %v535_v14 }
  0x49   :  { %499 = vmatprep.subr.bf16.mxu0 %v676_v0 }
  0x4b   :  { %482 = vmatpush3.bf16.msra.mxu1 %v529_v8 }
  0x4c   :  { %483 = vmatprep.subr.bf16.mxu1 %v676_v0  ;;  %500 = vmatpush3.bf16.msra.mxu0 %v536_v15 }
  0x4d   :  { %501 = vmatprep.subr.bf16.mxu0 %v676_v0 }
  0x4f   :  { %484 = vmatpush3.bf16.msra.mxu1 %v530_v9 }
  0x50   :  { %485 = vmatprep.subr.bf16.mxu1 %v676_v0  ;;  %502 = vmatpush3.bf16.msra.mxu0 %v537_v16 }
  0x51   :  { %503 = vmatprep.subr.bf16.mxu0 %v676_v0 }
  0x53   :  { %486 = vmatpush3.bf16.msra.mxu1 %v531_v10 }
  0x54   :  { %504 = vmatpush3.bf16.msra.mxu0 %v538_v25 }
  0x55   :  { %505 = vmatprep.subr.bf16.mxu0 %v676_v0 }
  0x58   :  { %506 = vmatpush3.bf16.msra.mxu0 %v539_v26 }
  0xfa   :  { %v138_v18 = vpop.f32.mrf.mxu0 }
  0xfb   :  { %v139_v19 = vadd.f32 %v424_v17, %v138_v18 }
  0xfc   :  { %v469_v20 = vpop.f32.mrf.mxu0 }
  0xfd   :  { %v144_v21 = vmax.f32 %v139_v19, 0.0 }
  0xfe   :  { %v141_v22 = vpop.f32.mrf.mxu0 }
  0xff   :  { %v145_v23 = vpack.c.bf16 %v144_v21, %v144_v21 }
 0x100   :  { %v470_v24 = vpop.f32.mrf.mxu0 }
 0x101   :  { %488 = vmatmul.mubr.bf16.vlgmr.msra.gmra.mxu1 %v145_v23 }
 0x1c1   :  { %v251_v28 = vpop.f32.mrf.mxu1 }
 0x1c2   :  { %v252_v29 = vadd.f32 %v427_v27, %v251_v28 }
 0x1c3   :  { %v489_v30 = vpop.f32.mrf.mxu1 }
 0x1c4   :  { %v257_v31 = vmax.f32 %v252_v29, 0.0 }
 0x1c5   :  { %v254_v32 = vpop.f32.mrf.mxu1 }
 0x1c6   :  { %v258_v33 = vpack.c.bf16 %v257_v31, %v257_v31 }
 0x1c7   :  { %v490_v34 = vpop.f32.mrf.mxu1 }
 0x1c8   :  { %508 = vmatmul.mubr.bf16.vlgmr.msra.gmra.mxu0 %v258_v33 }
 0x288   :  { %v364_v39 = vpop.f32.mrf.mxu0 }
 0x289   :  { %v365_v40 = vadd.f32 %v436_v38, %v364_v39 }
 0x28a   :  { %v509_v41 = vpop.f32.mrf.mxu0 }
 0x28b   :  { %370 = vst [vmem:[#allocation10] sm:$0xff] %v365_v40  ;;  %v381_v42 = vsel %vm380_vm4, %v365_v40, 0.0 }
 0x28c   :  { %v367_v43 = vpop.f32.mrf.mxu0  ;;  %382 = vadd.xlane.f32.xlu0 %v381_v42 }
 0x28e   :  { %v510_v44 = vpop.f32.mrf.mxu0 }
 0x28f   :  { %631 = shalt.err (!%p628_p10)
}
 0x290   :  { %402 = dma.vmem_to_hbm [thread:$0]  %s400_s28, 128, %s788_s7, [#allocation4]  }
 0x291   :  { %s679_s9 = smov [#allocation11]  }
 0x292   :  { %s409_s10 = sshll.u32 %s679_s9, 4  ;;  %s410_s10 = int_to_ptr.vmem [resolvable:$true] %s409_s10 }
 0x293   :  { %s640_s12 = scalar_lea.vmem %s410_s10, 128  ;;  %p645_p12 = scmp.lt.s32.totalorder %s410_s10, %s410_s10 }
 0x294   :  { %p641_p11 = scmp.ne.s32.totalorder %s410_s10, %s640_s12  ;;  %p646_p13 = scmp.lt.s32.totalorder %s640_s12, %s640_s12 }
 0x296   :  { %p647_p0 = por %p646_p13, %p645_p12 }
 0x298   :  { %p648_p1 = pnand %p647_p0, %p641_p11 }
 0x315   :  { %v383_v45 = vpop.xlane.xlu0 %382 }
 0x316   :  { %v384_v46 = vrot.slane %v383_v45, 4 }
 0x318   :  { %v385_v47 = vadd.f32 %v384_v46, %v383_v45 }
 0x31a   :  { %v386_v48 = vrot.slane %v385_v47, 2 }
 0x31c   :  { %v387_v49 = vadd.f32 %v386_v48, %v385_v47 }
 0x31e   :  { %v388_v50 = vrot.slane %v387_v49, 1 }
 0x320   :  { %v389_v51 = vadd.f32 %v388_v50, %v387_v49 }
 0x322   :  { %511 = vpush %v389_v51 }
 0x353   :  { %s512_s11 = spop %511 }
 0x354   :  { %v391_v52 = vstv %s512_s11 }
 0x355   :  { %392 = vst [vmem:[#allocation11] sm:$0xff] %v391_v52 }
 0x356   :  { %651 = shalt.err (!%p648_p1)
}
 0x357   :  { %412 = dma.vmem_to_hbm [thread:$0]  %s410_s10, 128, %s789_s8, [#allocation12]  }
 0x358   :  { %666 = dma.done.wait [#allocation4], 128  }
 0x359   :  { %667 = vsyncadd [#allocation4], 4294967168 }
 0x35a   :  { %668 = dma.done.wait [#allocation12], 128  }
 0x35b   :  { %669 = vsyncadd [#allocation12], 4294967168 }
 0x35c   :  { %419 = vsyncpa [#allocation3], 1 }
 0x35d   :  { %420 = vsyncpa [#allocation6], 1 }
 0x35e   :  { %421 = vsyncpa [#allocation9], 1 }
 0x35f   :  { %422 = vsyncpa [#allocation4], 1 }
 0x360   :  { %423 = vsyncpa [#allocation12], 1 }

</bundles_post_ra>
